<compile_context>
chip_gen: v6e
topology: v6e:2x2x1
jax: 0.10.0
libtpu: 0.0.40
codegen_flags: <defaults>
</compile_context>

<pallas_src>
import functools

import jax
import jax.numpy as jnp
from jax import lax
from jax.experimental import pallas as pl
from jax.experimental.pallas import tpu as pltpu


def _relu6(x):
    return jnp.clip(x, 0.0, 6.0)


def mbconv_kernel(x_ref, w1t_ref, b1_ref, taps_ref, b2_ref, w3t_ref, b3_ref,
                  o_ref, *, width):
    # x_ref:    (1, Cin, P)    one image per grid step, P = H*W on lanes
    # w1t_ref:  (Cmid, Cin)    expand 1x1 weight (transposed, BN1 scale folded)
    # b1_ref:   (Cmid, 1)      BN1 bias
    # taps_ref: (9, Cmid, P)   depthwise taps pre-multiplied by the SAME-padding
    #                          validity mask (BN2 scale folded)
    # b2_ref:   (Cmid, 1)      BN2 bias
    # w3t_ref:  (Cout, Cmid)   project 1x1 weight (transposed, BN3 scale folded)
    # b3_ref:   (Cout, 1)      BN3 bias
    # o_ref:    (1, Cout, P)
    P = x_ref.shape[-1]
    x = x_ref[0]                                       # (Cin, P)

    # ---- inverted 1x1 conv (scale folded) + BN bias + relu6 (MXU) ----
    mid = jnp.dot(w1t_ref[...], x, preferred_element_type=jnp.float32)
    mid = _relu6(mid + b1_ref[...])                    # (Cmid, P)

    # ---- depthwise 3x3, stride 1, SAME (scale folded) + bias + relu6 ----
    # Spatial positions sit on the lane axis, so each neighbour tap is a lane
    # rotation (XLU slot, overlaps the VALU FMAs).  Boundary handling is baked
    # into the pre-weighted taps (invalid lanes are zero).
    acc = mid * taps_ref[4]                            # centre tap inits acc
    k = 0
    for dh in (-1, 0, 1):
        for dv in (-1, 0, 1):
            if dh == 0 and dv == 0:
                k += 1
                continue
            off = dh * width + dv                      # flat (h, w) offset
            rolled = pltpu.roll(mid, (-off) % P, axis=1)
            acc = acc + rolled * taps_ref[k]
            k += 1
    dws = _relu6(acc + b2_ref[...])                    # (Cmid, P)

    # ---- pointwise 1x1 conv (scale folded) + BN bias (no act) (MXU) ----
    y = jnp.dot(w3t_ref[...], dws, preferred_element_type=jnp.float32)
    o_ref[0] = y + b3_ref[...]                         # lane-dense full stores


@jax.jit
def mbconv_forward(x_nchw, params):
    w1, s1, b1, dw, s2, b2, w3, s3, b3 = params
    N, Cin, H, W = x_nchw.shape
    Cmid = w1.shape[1]
    Cout = w3.shape[1]
    P = H * W

    # Fold BN scales into the conv weights (one-time, host side).
    w1t = (w1 * s1).T                                   # (Cmid, Cin)
    dwk = (dw * s2[0]).reshape(9, Cmid)[:, :, None]     # (9, Cmid, 1)
    w3t = (w3 * s3).T                                   # (Cout, Cmid)
    b1c = b1.reshape(Cmid, 1)
    b2c = b2.reshape(Cmid, 1)
    b3c = b3.reshape(Cout, 1)

    # Per-tap SAME-padding validity masks over the flattened spatial positions,
    # pre-multiplied by the tap weights (hoists mask*weight out of the kernel).
    hh = jnp.arange(H)[:, None]
    ww = jnp.arange(W)[None, :]
    masks = jnp.stack(
        [((hh + dh >= 0) & (hh + dh < H) & (ww + dv >= 0) & (ww + dv < W))
         .astype(jnp.float32).reshape(1, P)
         for dh in (-1, 0, 1) for dv in (-1, 0, 1)], axis=0)    # (9, 1, P)
    taps = dwk * masks                                          # (9, Cmid, P)

    # Channels-first with H*W on the lane axis: pure reshape, no transpose.
    x3 = x_nchw.reshape(N, Cin, P)

    # Invariant operands: constant index_maps -> DMA'd once, VMEM-resident.
    const2 = lambda shape: pl.BlockSpec(shape, lambda n: (0, 0))
    const3 = lambda shape: pl.BlockSpec(shape, lambda n: (0, 0, 0))

    flops = 2 * N * P * (Cin * Cmid + 9 * Cmid + Cmid * Cout)
    bytes_accessed = 4 * (N * Cin * P + N * Cout * P + 9 * Cmid * P
                          + Cmid * Cin + Cout * Cmid + 2 * Cmid + Cout)

    out = pl.pallas_call(
        functools.partial(mbconv_kernel, width=W),
        out_shape=jax.ShapeDtypeStruct((N, Cout, P), jnp.float32),
        grid_spec=pltpu.PrefetchScalarGridSpec(
            num_scalar_prefetch=0,
            grid=(N,),
            in_specs=[
                pl.BlockSpec((1, Cin, P), lambda n: (n, 0, 0)),   # x streams
                const2((Cmid, Cin)),                              # w1t
                const2((Cmid, 1)),                                # b1
                const3((9, Cmid, P)),                             # taps
                const2((Cmid, 1)),                                # b2
                const2((Cout, Cmid)),                             # w3t
                const2((Cout, 1)),                                # b3
            ],
            out_specs=pl.BlockSpec((1, Cout, P), lambda n: (n, 0, 0)),
        ),
        compiler_params=pltpu.CompilerParams(
            dimension_semantics=("parallel",)),
        cost_estimate=pl.CostEstimate(
            flops=flops, transcendentals=0, bytes_accessed=bytes_accessed),
    )(x3, w1t, b1c, taps, b2c, w3t, b3c)

    # TODO(synk): emit bf16 output / cast matmul operands to bf16 on v6e/v7x
    # once channel counts are production-sized; kept f32 at toy shapes.
    return out.reshape(N, Cout, H, W)


def mbconv_reference(x, params):
    """Pure-JAX NCHW reference (lax.conv) for verification."""
    w1, s1, b1, dw, s2, b2, w3, s3, b3 = params
    Cmid = w1.shape[1]

    def bn(y, s, b):
        return y * s[0][None, :, None, None] + b[0][None, :, None, None]

    y = lax.conv_general_dilated(
        x, jnp.transpose(w1)[:, :, None, None], (1, 1), 'SAME',
        dimension_numbers=('NCHW', 'OIHW', 'NCHW'))
    y = jnp.clip(bn(y, s1, b1), 0.0, 6.0)

    dwk = jnp.transpose(dw, (2, 0, 1))[:, None, :, :]  # (Cmid,1,3,3)
    y = lax.conv_general_dilated(
        y, dwk, (1, 1), 'SAME',
        dimension_numbers=('NCHW', 'OIHW', 'NCHW'),
        feature_group_count=Cmid)
    y = jnp.clip(bn(y, s2, b2), 0.0, 6.0)

    y = lax.conv_general_dilated(
        y, jnp.transpose(w3)[:, :, None, None], (1, 1), 'SAME',
        dimension_numbers=('NCHW', 'OIHW', 'NCHW'))
    return bn(y, s3, b3)


def _fold_bn(key, c, eps=1e-5):
    kg, kb, km, kv = jax.random.split(key, 4)
    gamma = 1.0 + 0.1 * jax.random.normal(kg, (c,), jnp.float32)
    beta = 0.1 * jax.random.normal(kb, (c,), jnp.float32)
    mean = 0.1 * jax.random.normal(km, (c,), jnp.float32)
    var = jnp.abs(jax.random.normal(kv, (c,), jnp.float32)) + 0.5
    scale = gamma / jnp.sqrt(var + eps)
    bias = beta - mean * scale
    return scale.reshape(1, c), bias.reshape(1, c)


if __name__ == "__main__":
    key = jax.random.PRNGKey(0)
    N, Cin, H, W = 2, 4, 16, 16
    Cout = 8
    expand_ratio = 6.0
    Cmid = round(Cin * expand_ratio)  # 24

    ks = jax.random.split(key, 8)
    x = jax.random.normal(ks[0], (N, Cin, H, W), jnp.float32)

    w1 = 0.2 * jax.random.normal(ks[1], (Cin, Cmid), jnp.float32)
    dw = 0.2 * jax.random.normal(ks[2], (3, 3, Cmid), jnp.float32)
    w3 = 0.2 * jax.random.normal(ks[3], (Cmid, Cout), jnp.float32)
    s1, b1 = _fold_bn(ks[4], Cmid)
    s2, b2 = _fold_bn(ks[5], Cmid)
    s3, b3 = _fold_bn(ks[6], Cout)

    params = (w1, s1, b1, dw, s2, b2, w3, s3, b3)

    out = jax.block_until_ready(mbconv_forward(x, params))
    ref = jax.block_until_ready(mbconv_reference(x, params))

    assert out.shape == (N, Cout, H, W), out.shape
    assert jnp.allclose(out, ref, rtol=1e-4, atol=2e-4), float(
        jnp.max(jnp.abs(out - ref)))
    print("KERNEL_OK")
</pallas_src>

<mosaic_0001>
module attributes {stable_mosaic.version = 11 : i64} {
  func.func @mbconv_kernel(%arg0: i32, %arg1: memref<1x4x256xf32, #tpu.memory_space<vmem>>, %arg2: memref<24x4xf32, #tpu.memory_space<vmem>>, %arg3: memref<24x1xf32, #tpu.memory_space<vmem>>, %arg4: memref<9x24x256xf32, #tpu.memory_space<vmem>>, %arg5: memref<24x1xf32, #tpu.memory_space<vmem>>, %arg6: memref<8x24xf32, #tpu.memory_space<vmem>>, %arg7: memref<8x1xf32, #tpu.memory_space<vmem>>, %arg8: memref<1x8x256xf32, #tpu.memory_space<vmem>>) attributes {dimension_semantics = [#tpu.dimension_semantics<parallel>], iteration_bounds = array<i64: 2>, scalar_prefetch = 0 : i64, scratch_operands = 0 : i64, tpu.core_type = #tpu.core_type<tc>, window_params = [{transform_indices = @transform_0, window_bounds = array<i64: 1, 4, 256>}, {pipeline_mode = #tpu.pipeline_mode<synchronous>, transform_indices = @transform_1, window_bounds = array<i64: 24, 4>}, {pipeline_mode = #tpu.pipeline_mode<synchronous>, transform_indices = @transform_2, window_bounds = array<i64: 24, 1>}, {pipeline_mode = #tpu.pipeline_mode<synchronous>, transform_indices = @transform_3, window_bounds = array<i64: 9, 24, 256>}, {pipeline_mode = #tpu.pipeline_mode<synchronous>, transform_indices = @transform_4, window_bounds = array<i64: 24, 1>}, {pipeline_mode = #tpu.pipeline_mode<synchronous>, transform_indices = @transform_5, window_bounds = array<i64: 8, 24>}, {pipeline_mode = #tpu.pipeline_mode<synchronous>, transform_indices = @transform_6, window_bounds = array<i64: 8, 1>}, {transform_indices = @transform_7, window_bounds = array<i64: 1, 8, 256>}]} {
    %c0 = arith.constant 0 : index
    %c0_0 = arith.constant 0 : index
    %c0_1 = arith.constant 0 : index
    %0 = vector.load %arg1[%c0, %c0_0, %c0_1] : memref<1x4x256xf32, #tpu.memory_space<vmem>>, vector<1x4x256xf32>
    %1 = vector.shape_cast %0 : vector<1x4x256xf32> to vector<4x256xf32>
    %c0_2 = arith.constant 0 : index
    %c0_3 = arith.constant 0 : index
    %2 = vector.load %arg2[%c0_2, %c0_3] : memref<24x4xf32, #tpu.memory_space<vmem>>, vector<24x4xf32>
    %cst = arith.constant dense<0.000000e+00> : vector<24x256xf32>
    %3 = tpu.matmul %2, %1, %cst {dimension_numbers = #tpu.dot_dimension_numbers<[1], [0], [0], [1], [0, 0, 1, 1], [], []>} : vector<24x4xf32>, vector<4x256xf32>, vector<24x256xf32> -> vector<24x256xf32>
    %c0_4 = arith.constant 0 : index
    %c0_5 = arith.constant 0 : index
    %4 = vector.load %arg3[%c0_4, %c0_5] : memref<24x1xf32, #tpu.memory_space<vmem>>, vector<24x1xf32>
    %5 = vector.broadcast %4 : vector<24x1xf32> to vector<24x256xf32>
    %6 = arith.addf %3, %5 : vector<24x256xf32>
    %cst_6 = arith.constant 0.000000e+00 : f32
    %cst_7 = arith.constant 6.000000e+00 : f32
    %7 = vector.broadcast %cst_6 : f32 to vector<24x256xf32>
    %8 = arith.maximumf %7, %6 : vector<24x256xf32>
    %9 = vector.broadcast %cst_7 : f32 to vector<24x256xf32>
    %10 = arith.minimumf %9, %8 : vector<24x256xf32>
    %c4 = arith.constant 4 : index
    %c0_8 = arith.constant 0 : index
    %c0_9 = arith.constant 0 : index
    %11 = vector.load %arg4[%c4, %c0_8, %c0_9] : memref<9x24x256xf32, #tpu.memory_space<vmem>>, vector<1x24x256xf32>
    %12 = vector.shape_cast %11 : vector<1x24x256xf32> to vector<24x256xf32>
    %13 = arith.mulf %10, %12 : vector<24x256xf32>
    %c17_i32 = arith.constant 17 : i32
    %14 = tpu.dynamic_rotate %10 by %c17_i32 dim 1 : vector<24x256xf32>, i32 -> vector<24x256xf32>
    %c0_10 = arith.constant 0 : index
    %c0_11 = arith.constant 0 : index
    %c0_12 = arith.constant 0 : index
    %15 = vector.load %arg4[%c0_10, %c0_11, %c0_12] : memref<9x24x256xf32, #tpu.memory_space<vmem>>, vector<1x24x256xf32>
    %16 = vector.shape_cast %15 : vector<1x24x256xf32> to vector<24x256xf32>
    %17 = arith.mulf %14, %16 : vector<24x256xf32>
    %18 = arith.addf %13, %17 : vector<24x256xf32>
    %c16_i32 = arith.constant 16 : i32
    %19 = tpu.dynamic_rotate %10 by %c16_i32 dim 1 : vector<24x256xf32>, i32 -> vector<24x256xf32>
    %c1 = arith.constant 1 : index
    %c0_13 = arith.constant 0 : index
    %c0_14 = arith.constant 0 : index
    %20 = vector.load %arg4[%c1, %c0_13, %c0_14] : memref<9x24x256xf32, #tpu.memory_space<vmem>>, vector<1x24x256xf32>
    %21 = vector.shape_cast %20 : vector<1x24x256xf32> to vector<24x256xf32>
    %22 = arith.mulf %19, %21 : vector<24x256xf32>
    %23 = arith.addf %18, %22 : vector<24x256xf32>
    %c15_i32 = arith.constant 15 : i32
    %24 = tpu.dynamic_rotate %10 by %c15_i32 dim 1 : vector<24x256xf32>, i32 -> vector<24x256xf32>
    %c2 = arith.constant 2 : index
    %c0_15 = arith.constant 0 : index
    %c0_16 = arith.constant 0 : index
    %25 = vector.load %arg4[%c2, %c0_15, %c0_16] : memref<9x24x256xf32, #tpu.memory_space<vmem>>, vector<1x24x256xf32>
    %26 = vector.shape_cast %25 : vector<1x24x256xf32> to vector<24x256xf32>
    %27 = arith.mulf %24, %26 : vector<24x256xf32>
    %28 = arith.addf %23, %27 : vector<24x256xf32>
    %c1_i32 = arith.constant 1 : i32
    %29 = tpu.dynamic_rotate %10 by %c1_i32 dim 1 : vector<24x256xf32>, i32 -> vector<24x256xf32>
    %c3 = arith.constant 3 : index
    %c0_17 = arith.constant 0 : index
    %c0_18 = arith.constant 0 : index
    %30 = vector.load %arg4[%c3, %c0_17, %c0_18] : memref<9x24x256xf32, #tpu.memory_space<vmem>>, vector<1x24x256xf32>
    %31 = vector.shape_cast %30 : vector<1x24x256xf32> to vector<24x256xf32>
    %32 = arith.mulf %29, %31 : vector<24x256xf32>
    %33 = arith.addf %28, %32 : vector<24x256xf32>
    %c255_i32 = arith.constant 255 : i32
    %34 = tpu.dynamic_rotate %10 by %c255_i32 dim 1 : vector<24x256xf32>, i32 -> vector<24x256xf32>
    %c5 = arith.constant 5 : index
    %c0_19 = arith.constant 0 : index
    %c0_20 = arith.constant 0 : index
    %35 = vector.load %arg4[%c5, %c0_19, %c0_20] : memref<9x24x256xf32, #tpu.memory_space<vmem>>, vector<1x24x256xf32>
    %36 = vector.shape_cast %35 : vector<1x24x256xf32> to vector<24x256xf32>
    %37 = arith.mulf %34, %36 : vector<24x256xf32>
    %38 = arith.addf %33, %37 : vector<24x256xf32>
    %c241_i32 = arith.constant 241 : i32
    %39 = tpu.dynamic_rotate %10 by %c241_i32 dim 1 : vector<24x256xf32>, i32 -> vector<24x256xf32>
    %c6 = arith.constant 6 : index
    %c0_21 = arith.constant 0 : index
    %c0_22 = arith.constant 0 : index
    %40 = vector.load %arg4[%c6, %c0_21, %c0_22] : memref<9x24x256xf32, #tpu.memory_space<vmem>>, vector<1x24x256xf32>
    %41 = vector.shape_cast %40 : vector<1x24x256xf32> to vector<24x256xf32>
    %42 = arith.mulf %39, %41 : vector<24x256xf32>
    %43 = arith.addf %38, %42 : vector<24x256xf32>
    %c240_i32 = arith.constant 240 : i32
    %44 = tpu.dynamic_rotate %10 by %c240_i32 dim 1 : vector<24x256xf32>, i32 -> vector<24x256xf32>
    %c7 = arith.constant 7 : index
    %c0_23 = arith.constant 0 : index
    %c0_24 = arith.constant 0 : index
    %45 = vector.load %arg4[%c7, %c0_23, %c0_24] : memref<9x24x256xf32, #tpu.memory_space<vmem>>, vector<1x24x256xf32>
    %46 = vector.shape_cast %45 : vector<1x24x256xf32> to vector<24x256xf32>
    %47 = arith.mulf %44, %46 : vector<24x256xf32>
    %48 = arith.addf %43, %47 : vector<24x256xf32>
    %c239_i32 = arith.constant 239 : i32
    %49 = tpu.dynamic_rotate %10 by %c239_i32 dim 1 : vector<24x256xf32>, i32 -> vector<24x256xf32>
    %c8 = arith.constant 8 : index
    %c0_25 = arith.constant 0 : index
    %c0_26 = arith.constant 0 : index
    %50 = vector.load %arg4[%c8, %c0_25, %c0_26] : memref<9x24x256xf32, #tpu.memory_space<vmem>>, vector<1x24x256xf32>
    %51 = vector.shape_cast %50 : vector<1x24x256xf32> to vector<24x256xf32>
    %52 = arith.mulf %49, %51 : vector<24x256xf32>
    %53 = arith.addf %48, %52 : vector<24x256xf32>
    %c0_27 = arith.constant 0 : index
    %c0_28 = arith.constant 0 : index
    %54 = vector.load %arg5[%c0_27, %c0_28] : memref<24x1xf32, #tpu.memory_space<vmem>>, vector<24x1xf32>
    %55 = vector.broadcast %54 : vector<24x1xf32> to vector<24x256xf32>
    %56 = arith.addf %53, %55 : vector<24x256xf32>
    %cst_29 = arith.constant 0.000000e+00 : f32
    %cst_30 = arith.constant 6.000000e+00 : f32
    %57 = vector.broadcast %cst_29 : f32 to vector<24x256xf32>
    %58 = arith.maximumf %57, %56 : vector<24x256xf32>
    %59 = vector.broadcast %cst_30 : f32 to vector<24x256xf32>
    %60 = arith.minimumf %59, %58 : vector<24x256xf32>
    %c0_31 = arith.constant 0 : index
    %c0_32 = arith.constant 0 : index
    %61 = vector.load %arg6[%c0_31, %c0_32] : memref<8x24xf32, #tpu.memory_space<vmem>>, vector<8x24xf32>
    %cst_33 = arith.constant dense<0.000000e+00> : vector<8x256xf32>
    %62 = tpu.matmul %61, %60, %cst_33 {dimension_numbers = #tpu.dot_dimension_numbers<[1], [0], [0], [1], [0, 0, 1, 1], [], []>} : vector<8x24xf32>, vector<24x256xf32>, vector<8x256xf32> -> vector<8x256xf32>
    %c0_34 = arith.constant 0 : index
    %c0_35 = arith.constant 0 : index
    %63 = vector.load %arg7[%c0_34, %c0_35] : memref<8x1xf32, #tpu.memory_space<vmem>>, vector<8x1xf32>
    %64 = vector.broadcast %63 : vector<8x1xf32> to vector<8x256xf32>
    %65 = arith.addf %62, %64 : vector<8x256xf32>
    %c0_36 = arith.constant 0 : index
    %c0_37 = arith.constant 0 : index
    %c0_38 = arith.constant 0 : index
    %66 = vector.load %arg8[%c0_36, %c0_37, %c0_38] : memref<1x8x256xf32, #tpu.memory_space<vmem>>, vector<1x8x256xf32>
    %67 = vector.shape_cast %66 : vector<1x8x256xf32> to vector<8x256xf32>
    %68 = vector.shape_cast %65 : vector<8x256xf32> to vector<1x8x256xf32>
    tpu.vector_store %arg8[%c0_36, %c0_37, %c0_38], %68 {strides = array<i32>} : memref<1x8x256xf32, #tpu.memory_space<vmem>>, vector<1x8x256xf32>,
    return
  }
  func.func @transform_0(%arg0: i32) -> (i32, i32, i32) {
    %c0_i32 = arith.constant 0 : i32
    %c0_i32_0 = arith.constant 0 : i32
    %c0_i32_1 = arith.constant 0 : i32
    return %arg0, %c0_i32, %c0_i32_0 : i32, i32, i32
  }
  func.func @transform_1(%arg0: i32) -> (i32, i32) {
    %c0_i32 = arith.constant 0 : i32
    %c0_i32_0 = arith.constant 0 : i32
    %c0_i32_1 = arith.constant 0 : i32
    return %c0_i32, %c0_i32_0 : i32, i32
  }
  func.func @transform_2(%arg0: i32) -> (i32, i32) {
    %c0_i32 = arith.constant 0 : i32
    %c0_i32_0 = arith.constant 0 : i32
    %c0_i32_1 = arith.constant 0 : i32
    return %c0_i32, %c0_i32_0 : i32, i32
  }
  func.func @transform_3(%arg0: i32) -> (i32, i32, i32) {
    %c0_i32 = arith.constant 0 : i32
    %c0_i32_0 = arith.constant 0 : i32
    %c0_i32_1 = arith.constant 0 : i32
    %c0_i32_2 = arith.constant 0 : i32
    return %c0_i32, %c0_i32_0, %c0_i32_1 : i32, i32, i32
  }
  func.func @transform_4(%arg0: i32) -> (i32, i32) {
    %c0_i32 = arith.constant 0 : i32
    %c0_i32_0 = arith.constant 0 : i32
    %c0_i32_1 = arith.constant 0 : i32
    return %c0_i32, %c0_i32_0 : i32, i32
  }
  func.func @transform_5(%arg0: i32) -> (i32, i32) {
    %c0_i32 = arith.constant 0 : i32
    %c0_i32_0 = arith.constant 0 : i32
    %c0_i32_1 = arith.constant 0 : i32
    return %c0_i32, %c0_i32_0 : i32, i32
  }
  func.func @transform_6(%arg0: i32) -> (i32, i32) {
    %c0_i32 = arith.constant 0 : i32
    %c0_i32_0 = arith.constant 0 : i32
    %c0_i32_1 = arith.constant 0 : i32
    return %c0_i32, %c0_i32_0 : i32, i32
  }
  func.func @transform_7(%arg0: i32) -> (i32, i32, i32) {
    %c0_i32 = arith.constant 0 : i32
    %c0_i32_0 = arith.constant 0 : i32
    %c0_i32_1 = arith.constant 0 : i32
    return %arg0, %c0_i32, %c0_i32_0 : i32, i32, i32
  }
}

</mosaic_0001>

<bundles_post_ra>
// kernel: mul.32
= control target key start
LH: loop header
LB: loop body
LE: loop exit
PB: predicated region body
PF: predicated region fallthrough
CT: control target
= control target key end

     0   :  { %vm17_vm0 = vcmask 195584   ;;  %s62_s0 = inlined_call_operand.vmem [shape: f32[3,3,24], index: 0, kind: input, shape index: {}]   ;;  %s63_s1 = inlined_call_operand.vmem [shape: f32[9,24], index: 1, kind: output, shape index: {}]  }
   0x1   :  { %v30_v0 = vld [vmem:[%s62_s0 + $0x8] sm:$0xf]  ;;  %v31_v1 = vld [vmem:[%s62_s0 + $0x4] sm:$0xf]  ;;  %v14_v2 = vld [vmem:[%s62_s0] sm:$0xf] }
   0x2   :  { %9 = vst [vmem:[#allocation0] sm:$0xf] %v30_v0  ;;  %13 = vst [vmem:[#allocation0 + $0x10] sm:$0xf] %v31_v1 }
   0x3   :  { %15 = vst [vmem:[#allocation0 + $0x8] sm:$0xf] %v14_v2 }
   0x9   :  { %v20_v4 = vld [vmem:[#allocation0 + $0x10] sm:$0x7]   ;;  %v25_v5 = vld [vmem:[#allocation0] sm:$0x7]  }
   0xa   :  { %v16_v3 = vld [vmem:[#allocation0 + $0x8] sm:$0x7]   ;;  %32 = vst.msk [vmem:[%s63_s1 + $0x3] sm:$0x7] %vm17_vm0, %v20_v4   ;;  %33 = vst.msk [vmem:[%s63_s1 + $0x6] sm:$0x7] %vm17_vm0, %v25_v5  }
   0xb   :  { %18 = vst.msk [vmem:[%s63_s1] sm:$0x7] %vm17_vm0, %v16_v3  }

// kernel: mbconv_forward.1
= control target key start
LH: loop header
LB: loop body
LE: loop exit
PB: predicated region body
PF: predicated region fallthrough
CT: control target
= control target key end

     0   :  { %s1052_s24 = smov 0   ;;  %s1534_s0 = inlined_call_operand.vmem [shape: f32[2,4,256], index: 0, kind: input, shape index: {}]   ;;  %s1535_s1 = inlined_call_operand.vmem [shape: f32[24,4], index: 1, kind: input, shape index: {}]   ;;  %s1536_s2 = inlined_call_operand.vmem [shape: f32[24,1], index: 2, kind: input, shape index: {}]   ;;  %s1537_s3 = inlined_call_operand.vmem [shape: f32[9,24,256], index: 3, kind: input, shape index: {}]   ;;  %s1538_s4 = inlined_call_operand.vmem [shape: f32[24,1], index: 4, kind: input, shape index: {}]   ;;  %s1539_s5 = inlined_call_operand.vmem [shape: f32[8,24], index: 5, kind: input, shape index: {}]   ;;  %s1540_s6 = inlined_call_operand.vmem [shape: f32[8,1], index: 6, kind: input, shape index: {}]   ;;  %s1541_s7 = inlined_call_operand.vmem [shape: f32[2,8,256], index: 7, kind: output, shape index: {}]  }
   0x1 LB: > { %s906_s25 = sadd.s32 4294967295, %s1000_s24   ;;  %p910_p0 = scmp.ge.s32.totalorder %s1000_s24, 1  ;;  %s1000_s24 = sphi %s1052_s24, %s17_s24  }
   0x2   : > { %p237_p1 = scmp.lt.s32.totalorder %s1000_s24, 3 }
   0x4   : > { %p238_p2 = pnand %p910_p0, %p237_p1 }
   0x5   : > { %p269_p3 = scmp.lt.s32.totalorder (!%p238_p2), %s906_s25, 1  ;;  %s1004_s23 = smov (!%p238_p2), 112  }
   0x6   : > { %241 = sbr.rel (%p238_p2) target bundleno = 645 (0x285), region = 48  ;;  %s1005_s26 = smov (!%p238_p2), 17  }
   0x7   : > { %s1006_s27 = smov (!%p238_p2), 16   ;;  %s1007_s28 = smov (!%p238_p2), 15  }
   0x8   : > { %s1008_s29 = smov (!%p238_p2), 1   ;;  %s1010_s8 = smov (!%p238_p2), 113  }
   0x9   : > { %s1011_s9 = smov (!%p238_p2), 111  }
   0xb   : > { %v1002_v0 = vmov 0.0   ;;  %v283_v1 = vld [vmem:[%s1536_s2] sm:$0xff]  ;;  %s1543_s25 = smov (!%p269_p3, %s906_s25), 1  ;;  %v1003_v2 = vmov 0   ;;  %v285_v3 = vld [vmem:[%s1536_s2 + $0x10] sm:$0xff]  ;;  %v284_v5 = vld [vmem:[%s1536_s2 + $0x8] sm:$0xff]  ;;  %v438_v41 = vlaneseq }
   0xc   : > { %382 = vmatprep.mubr.f32.mxu0 %v1002_v0  ;;  %842 = vmatprep.mubr.f32.mxu1 %v1002_v0  ;;  %s971_s30 = sshll.u32 %s1543_s25, 3  ;;  %v733_v4 = vld [vmem:[%s1538_s4 + $0x10] sm:$0xff]  ;;  %vm313_vm0 = vcmask 1043456   ;;  %v280_v8 = vld [vmem:[%s1535_s1] sm:$0xff]  ;;  %vm303_vm1 = vcmask 31744   ;;  %v732_v9 = vld [vmem:[%s1538_s4 + $0x8] sm:$0xff] }
   0xd   : > { %992 = vset.pattern.permute.xlu1 %v1003_v2  ;;  %991 = vset.pattern.permute.xlu0 %v1003_v2  ;;  %s273_s14 = scalar_lea.vmem %s1534_s0, %s971_s30  ;;  %v281_v10 = vld [vmem:[%s1535_s1 + $0x8] sm:$0xff]  ;;  %v282_v11 = vld [vmem:[%s1535_s1 + $0x10] sm:$0xff]  ;;  %s1009_s30 = smov 127   ;;  %v768_v39 = vld [vmem:[%s1540_s6] sm:$0xff]  ;;  %v1208_v44 = vand.u32 127, %v438_v41  ;;  %vm774_vm10 = vcmask 195584  }
   0xe   : > { %288 = vperm.xlu1 %992, %v283_v1   ;;  %298 = vperm.xlu0 %991, %v285_v3   ;;  %v279_v6 = vld [vmem:[%s273_s14] sm:$0xff]  ;;  %v448_v49 = vld [vmem:[%s1537_s3 + $0x8] sm:$0xff]  ;;  %v926_v58 = vld [vmem:[%s1537_s3 + $0x30] sm:$0xff]  ;;  %s972_s19 = sshll.u32 %s1543_s25, 4 }
   0xf   : > { %v302_v7 = vcombine.high %v279_v6, %v279_v6  ;;  %v731_v40 = vld [vmem:[%s1538_s4] sm:$0xff]  ;;  %vm440_vm2 = vcmp.lt.s32.totalorder %v1208_v44, 17  ;;  %v921_v52 = vld [vmem:[%s1537_s3 + $0xc8] sm:$0xff]  ;;  %vm477_vm3 = vcmp.lt.s32.totalorder %v1208_v44, 16  ;;  %v927_v59 = vld [vmem:[%s1537_s3 + $0x38] sm:$0xff]  ;;  %vm515_vm4 = vcmp.lt.s32.totalorder %v1208_v44, 15  ;;  %s278_s22 = scalar_lea.vmem %s1541_s7, %s972_s19 }
  0x10   : > { %v920_v47 = vld [vmem:[%s1537_s3 + $0xc0] sm:$0xff]  ;;  %vm553_vm5 = vcmp.lt.s32.totalorder %v1208_v44, 1  ;;  %vm591_vm6 = vcmp.lt.s32.totalorder %v1208_v44, 127  ;;  %vm629_vm7 = vcmp.lt.s32.totalorder %v1208_v44, 113  ;;  %vm667_vm8 = vcmp.lt.s32.totalorder %v1208_v44, 112 }
  0x11   : > { %915 = vmatprep.subr.msk.mxu0 %vm313_vm0, %v302_v7  ;;  %v447_v48 = vld [vmem:[%s1537_s3] sm:$0xff]  ;;  %vm705_vm9 = vcmp.lt.s32.totalorder %v1208_v44, 111 }
  0x12   : > { %746 = vperm.xlu1 %992, %v733_v4   ;;  %293 = vperm.xlu0 %991, %v284_v5   ;;  %v932_v5 = vld [vmem:[%s1537_s3 + $0x60] sm:$0xff] }
  0x13   : > { %916 = vmatpush1.msk.msra.mxu0 %vm313_vm0, %v279_v6  ;;  %v933_v6 = vld [vmem:[%s1537_s3 + $0x68] sm:$0xff] }
  0x14   : > { %917 = vmatmul.mubr.msk.f32.vlgmr.msra.gmra.mxu0 %vm303_vm1, %v280_v8 }
  0x15   : > { %388 = vmatprep.mubr.f32.mxu0 %v1002_v0 }
  0x16   : > { %741 = vperm.xlu0 %991, %v732_v9  }
  0x18   : > { %918 = vmatmul.mubr.msk.f32.gmra.mxu0 %vm303_vm1, %v281_v10 }
  0x19   : > { %394 = vmatprep.mubr.f32.mxu0 %v1002_v0 }
  0x1c   : > { %919 = vmatmul.mubr.msk.f32.gmra.mxu0 %vm303_vm1, %v282_v11 }
  0x89   : > { %v289_v12 = vpop.permute.xlu1 %288  ;;  %v299_v21 = vpop.permute.xlu0 %298 }
  0x8d   : > { %v294_v23 = vpop.permute.xlu0 %293  ;;  %v1204_v42 = vpop.permute.xlu1 %746 }
  0x91   : > { %v1206_v43 = vpop.permute.xlu0 %741 }
  0xd4   : > { %v384_v13 = vpop.f32.mrf.mxu0 }
  0xd5   : > { %v385_v14 = vadd.f32 %v384_v13, %v289_v12 }
  0xd6   : > { %v386_v15 = vpop.f32.mrf.mxu0 }
  0xd7   : > { %v401_v16 = vmax.f32 %v385_v14, 0.0  ;;  %v387_v17 = vadd.f32 %v386_v15, %v289_v12  ;;  %v938_v15 = vld [vmem:[%s1537_s3 + $0x90] sm:$0xff] }
  0xd8   : > { %v390_v22 = vpop.f32.mrf.mxu0 }
  0xd9   : > { %v1090_v18 = vmin.f32 %v401_v16, 6.0  ;;  %v402_v19 = vmax.f32 %v387_v17, 0.0  ;;  %v391_v24 = vadd.f32 %v390_v22, %v294_v23  ;;  %v939_v16 = vld [vmem:[%s1537_s3 + $0x98] sm:$0xff] }
  0xda   : > { %v392_v26 = vpop.f32.mrf.mxu0 }
  0xdb   : > { %655 = vrot.lane.b32.xlu0 %v1090_v18, %s1004_s23  ;;  %426 = vrot.lane.b32.xlu1 %v1090_v18, %s1005_s26  ;;  %v1096_v20 = vmin.f32 %v402_v19, 6.0  ;;  %v403_v25 = vmax.f32 %v391_v24, 0.0  ;;  %v393_v27 = vadd.f32 %v392_v26, %v294_v23  ;;  %v420_v55 = vmul.f32 %v920_v47, %v1090_v18  ;;  %v945_v26 = vld [vmem:[%s1537_s3 + $0xf8] sm:$0xff] }
  0xdc   : > { %v396_v31 = vpop.f32.mrf.mxu0 }
  0xdd   : > { %v1118_v28 = vmin.f32 %v403_v25, 6.0  ;;  %v404_v29 = vmax.f32 %v393_v27, 0.0  ;;  %v397_v34 = vadd.f32 %v396_v31, %v299_v21  ;;  %v421_v60 = vmul.f32 %v921_v52, %v1096_v20  ;;  %v944_v25 = vld [vmem:[%s1537_s3 + $0xf0] sm:$0xff] }
  0xde   : > { %v398_v32 = vpop.f32.mrf.mxu0 }
  0xdf   : > { %432 = vrot.lane.b32.xlu0 %v1096_v20, %s1005_s26  ;;  %465 = vrot.lane.b32.xlu1 %v1090_v18, %s1006_s27  ;;  %v1128_v30 = vmin.f32 %v404_v29, 6.0  ;;  %v399_v33 = vadd.f32 %v398_v32, %v299_v21  ;;  %v405_v36 = vmax.f32 %v397_v34, 0.0 }
  0xe1   : > { %v406_v35 = vmax.f32 %v399_v33, 0.0  ;;  %v1164_v38 = vmin.f32 %v405_v36, 6.0 }
  0xe3   : > { %471 = vrot.lane.b32.xlu0 %v1096_v20, %s1006_s27  ;;  %503 = vrot.lane.b32.xlu1 %v1090_v18, %s1007_s28  ;;  %v1158_v37 = vmin.f32 %v406_v35, 6.0 }
  0xe7   : > { %509 = vrot.lane.b32.xlu0 %v1096_v20, %s1007_s28  ;;  %541 = vrot.lane.b32.xlu1 %v1090_v18, %s1008_s29 }
  0xeb   : > { %547 = vrot.lane.b32.xlu0 %v1096_v20, %s1008_s29  ;;  %579 = vrot.lane.b32.xlu1 %v1090_v18, %s1009_s30 }
  0xef   : > { %585 = vrot.lane.b32.xlu0 %v1096_v20, %s1009_s30  ;;  %617 = vrot.lane.b32.xlu1 %v1090_v18, %s1010_s8 }
  0xf3   : > { %623 = vrot.lane.b32.xlu0 %v1096_v20, %s1010_s8  ;;  %693 = vrot.lane.b32.xlu1 %v1090_v18, %s1011_s9 }
  0xf7   : > { %695 = vrot.lane.b32.xlu0 %v1118_v28, %s1011_s9  ;;  %661 = vrot.lane.b32.xlu1 %v1096_v20, %s1004_s23 }
  0xfb   : > { %434 = vrot.lane.b32.xlu0 %v1128_v30, %s1005_s26  ;;  %428 = vrot.lane.b32.xlu1 %v1118_v28, %s1005_s26 }
  0xff   : > { %473 = vrot.lane.b32.xlu0 %v1128_v30, %s1006_s27  ;;  %467 = vrot.lane.b32.xlu1 %v1118_v28, %s1006_s27 }
 0x103   : > { %511 = vrot.lane.b32.xlu0 %v1128_v30, %s1007_s28  ;;  %505 = vrot.lane.b32.xlu1 %v1118_v28, %s1007_s28 }
 0x107   : > { %549 = vrot.lane.b32.xlu0 %v1128_v30, %s1008_s29  ;;  %543 = vrot.lane.b32.xlu1 %v1118_v28, %s1008_s29 }
 0x10b   : > { %587 = vrot.lane.b32.xlu0 %v1128_v30, %s1009_s30  ;;  %581 = vrot.lane.b32.xlu1 %v1118_v28, %s1009_s30 }
 0x10f   : > { %625 = vrot.lane.b32.xlu0 %v1128_v30, %s1010_s8  ;;  %619 = vrot.lane.b32.xlu1 %v1118_v28, %s1010_s8 }
 0x113   : > { %663 = vrot.lane.b32.xlu0 %v1128_v30, %s1004_s23  ;;  %657 = vrot.lane.b32.xlu1 %v1118_v28, %s1004_s23 }
 0x117   : > { %436 = vrot.lane.b32.xlu0 %v1158_v37, %s1005_s26  ;;  %701 = vrot.lane.b32.xlu1 %v1128_v30, %s1011_s9 }
 0x11b   : > { %475 = vrot.lane.b32.xlu0 %v1158_v37, %s1006_s27  ;;  %430 = vrot.lane.b32.xlu1 %v1164_v38, %s1005_s26 }
 0x11f   : > { %513 = vrot.lane.b32.xlu0 %v1158_v37, %s1007_s28  ;;  %469 = vrot.lane.b32.xlu1 %v1164_v38, %s1006_s27 }
 0x123   : > { %551 = vrot.lane.b32.xlu0 %v1158_v37, %s1008_s29  ;;  %507 = vrot.lane.b32.xlu1 %v1164_v38, %s1007_s28 }
 0x127   : > { %589 = vrot.lane.b32.xlu0 %v1158_v37, %s1009_s30  ;;  %545 = vrot.lane.b32.xlu1 %v1164_v38, %s1008_s29 }
 0x12b   : > { %627 = vrot.lane.b32.xlu0 %v1158_v37, %s1010_s8  ;;  %583 = vrot.lane.b32.xlu1 %v1164_v38, %s1009_s30 }
 0x12f   : > { %665 = vrot.lane.b32.xlu0 %v1158_v37, %s1004_s23  ;;  %621 = vrot.lane.b32.xlu1 %v1164_v38, %s1010_s8 }
 0x133   : > { %703 = vrot.lane.b32.xlu0 %v1158_v37, %s1011_s9  ;;  %659 = vrot.lane.b32.xlu1 %v1164_v38, %s1004_s23 }
 0x137   : > { %699 = vrot.lane.b32.xlu0 %v1096_v20, %s1011_s9  ;;  %697 = vrot.lane.b32.xlu1 %v1164_v38, %s1011_s9 }
 0x13b   : > { %771 = vperm.xlu0 %991, %v768_v39   ;;  %736 = vperm.xlu1 %992, %v731_v40   ;;  %v950_v39 = vld [vmem:[%s1537_s3 + $0x120] sm:$0xff]  ;;  %v951_v40 = vld [vmem:[%s1537_s3 + $0x128] sm:$0xff] }
 0x14d   : > { %v1210_v45 = vpop.permute.xlu0 %655  ;;  %v427_v46 = vpop.permute.xlu1 %426 }
 0x151   : > { %v433_v50 = vpop.permute.xlu0 %432  ;;  %v466_v51 = vpop.permute.xlu1 %465 }
 0x152   : > { %v441_v53 = vsel %vm440_vm2, %v427_v46, %v433_v50  ;;  %v444_v54 = vsel %vm440_vm2, %v433_v50, %v427_v46 }
 0x153   : > { %v453_v56 = vmul.f32 %v447_v48, %v444_v54  ;;  %v454_v57 = vmul.f32 %v448_v49, %v441_v53  ;;  %v956_v53 = vld [vmem:[%s1537_s3 + $0x150] sm:$0xff]  ;;  %v957_v54 = vld [vmem:[%s1537_s3 + $0x158] sm:$0xff] }
 0x155   : > { %v459_v61 = vadd.f32 %v453_v56, %v420_v55  ;;  %v472_v62 = vpop.permute.xlu0 %471  ;;  %v504_v63 = vpop.permute.xlu1 %503  ;;  %v460_v2 = vadd.f32 %v454_v57, %v421_v60 }
 0x156   : > { %v478_v0 = vsel %vm477_vm3, %v466_v51, %v472_v62  ;;  %v481_v1 = vsel %vm477_vm3, %v472_v62, %v466_v51 }
 0x157   : > { %v491_v3 = vmul.f32 %v926_v58, %v481_v1  ;;  %v492_v4 = vmul.f32 %v927_v59, %v478_v0 }
 0x159   : > { %v497_v7 = vadd.f32 %v491_v3, %v459_v61  ;;  %v498_v8 = vadd.f32 %v492_v4, %v460_v2  ;;  %v510_v9 = vpop.permute.xlu0 %509  ;;  %v542_v10 = vpop.permute.xlu1 %541 }
 0x15a   : > { %v516_v11 = vsel %vm515_vm4, %v504_v63, %v510_v9  ;;  %v519_v12 = vsel %vm515_vm4, %v510_v9, %v504_v63 }
 0x15b   : > { %v529_v13 = vmul.f32 %v932_v5, %v519_v12  ;;  %v530_v14 = vmul.f32 %v933_v6, %v516_v11 }
 0x15d   : > { %v535_v17 = vadd.f32 %v529_v13, %v497_v7  ;;  %v536_v18 = vadd.f32 %v530_v14, %v498_v8  ;;  %v548_v19 = vpop.permute.xlu0 %547  ;;  %v580_v20 = vpop.permute.xlu1 %579 }
 0x15e   : > { %v554_v21 = vsel %vm553_vm5, %v542_v10, %v548_v19  ;;  %v557_v22 = vsel %vm553_vm5, %v548_v19, %v542_v10 }
 0x15f   : > { %v567_v23 = vmul.f32 %v938_v15, %v557_v22  ;;  %v568_v24 = vmul.f32 %v939_v16, %v554_v21  ;;  %v449_v16 = vld [vmem:[%s1537_s3 + $0x10] sm:$0xff] }
 0x160   : > { %v922_v22 = vld [vmem:[%s1537_s3 + $0xd0] sm:$0xff] }
 0x161   : > { %v573_v27 = vadd.f32 %v567_v23, %v535_v17  ;;  %v574_v29 = vadd.f32 %v568_v24, %v536_v18  ;;  %v586_v31 = vpop.permute.xlu0 %585  ;;  %v618_v32 = vpop.permute.xlu1 %617  ;;  %v928_v23 = vld [vmem:[%s1537_s3 + $0x40] sm:$0xff] }
 0x162   : > { %v592_v33 = vsel %vm591_vm6, %v580_v20, %v586_v31  ;;  %v595_v34 = vsel %vm591_vm6, %v586_v31, %v580_v20  ;;  %v450_v20 = vld [vmem:[%s1537_s3 + $0x18] sm:$0xff] }
 0x163   : > { %v605_v35 = vmul.f32 %v944_v25, %v592_v33  ;;  %v606_v36 = vmul.f32 %v945_v26, %v595_v34  ;;  %v923_v25 = vld [vmem:[%s1537_s3 + $0xd8] sm:$0xff] }
 0x165   : > { %v611_v41 = vadd.f32 %v605_v35, %v573_v27  ;;  %v612_v46 = vadd.f32 %v606_v36, %v574_v29  ;;  %v624_v47 = vpop.permute.xlu0 %623  ;;  %v1282_v48 = vpop.permute.xlu1 %693  ;;  %v929_v27 = vld [vmem:[%s1537_s3 + $0x48] sm:$0xff]  ;;  %v422_v36 = vmul.f32 %v922_v22, %v1118_v28 }
 0x166   : > { %v630_v49 = vsel %vm629_vm7, %v618_v32, %v624_v47  ;;  %v633_v50 = vsel %vm629_vm7, %v624_v47, %v618_v32  ;;  %v934_v32 = vld [vmem:[%s1537_s3 + $0x70] sm:$0xff] }
 0x167   : > { %v643_v51 = vmul.f32 %v950_v39, %v630_v49  ;;  %v644_v52 = vmul.f32 %v951_v40, %v633_v50  ;;  %v935_v40 = vld [vmem:[%s1537_s3 + $0x78] sm:$0xff]  ;;  %v940_v49 = vld [vmem:[%s1537_s3 + $0xa0] sm:$0xff] }
 0x169   : > { %v649_v55 = vadd.f32 %v643_v51, %v611_v41  ;;  %v650_v56 = vadd.f32 %v644_v52, %v612_v46  ;;  %v1295_v57 = vpop.permute.xlu0 %695  ;;  %v662_v58 = vpop.permute.xlu1 %661  ;;  %v423_v46 = vmul.f32 %v923_v25, %v1128_v30  ;;  %v941_v52 = vld [vmem:[%s1537_s3 + $0xa8] sm:$0xff]  ;;  %v946_v30 = vld [vmem:[%s1537_s3 + $0x100] sm:$0xff] }
 0x16a   : > { %v668_v59 = vsel %vm667_vm8, %v1210_v45, %v662_v58  ;;  %v671_v60 = vsel %vm667_vm8, %v662_v58, %v1210_v45 }
 0x16b   : > { %v681_v61 = vmul.f32 %v956_v53, %v668_v59  ;;  %v682_v62 = vmul.f32 %v957_v54, %v671_v60 }
 0x16d   : > { %v435_v63 = vpop.permute.xlu0 %434  ;;  %v429_v0 = vpop.permute.xlu1 %428  ;;  %v1303_v1 = vadd.f32 %v682_v62, %v650_v56  ;;  %v1305_v2 = vadd.f32 %v681_v61, %v649_v55  ;;  %v947_v62 = vld [vmem:[%s1537_s3 + $0x108] sm:$0xff] }
 0x16e   : > { %v445_v17 = vsel %vm440_vm2, %v435_v63, %v429_v0  ;;  %v442_v21 = vsel %vm440_vm2, %v429_v0, %v435_v63  ;;  %v924_v0 = vld [vmem:[%s1537_s3 + $0xe0] sm:$0xff] }
 0x16f   : > { %v455_v26 = vmul.f32 %v449_v16, %v445_v17  ;;  %v456_v31 = vmul.f32 %v450_v20, %v442_v21  ;;  %v424_v21 = vmul.f32 %v924_v0, %v1164_v38 }
 0x171   : > { %v474_v3 = vpop.permute.xlu0 %473  ;;  %v468_v4 = vpop.permute.xlu1 %467  ;;  %v461_v51 = vadd.f32 %v455_v26, %v422_v36  ;;  %v462_v54 = vadd.f32 %v456_v31, %v423_v46  ;;  %v952_v26 = vld [vmem:[%s1537_s3 + $0x130] sm:$0xff]  ;;  %v953_v31 = vld [vmem:[%s1537_s3 + $0x138] sm:$0xff] }
 0x172   : > { %v482_v24 = vsel %vm477_vm3, %v474_v3, %v468_v4  ;;  %v479_v29 = vsel %vm477_vm3, %v468_v4, %v474_v3  ;;  %v925_v3 = vld [vmem:[%s1537_s3 + $0xe8] sm:$0xff] }
 0x173   : > { %v493_v39 = vmul.f32 %v928_v23, %v482_v24  ;;  %v494_v47 = vmul.f32 %v929_v27, %v479_v29  ;;  %v425_v22 = vmul.f32 %v925_v3, %v1158_v37  ;;  %v931_v37 = vld [vmem:[%s1537_s3 + $0x58] sm:$0xff] }
 0x175   : > { %v512_v5 = vpop.permute.xlu0 %511  ;;  %v506_v6 = vpop.permute.xlu1 %505  ;;  %v499_v60 = vadd.f32 %v493_v39, %v461_v51  ;;  %v500_v4 = vadd.f32 %v494_v47, %v462_v54 }
 0x176   : > { %v520_v33 = vsel %vm515_vm4, %v512_v5, %v506_v6  ;;  %v517_v41 = vsel %vm515_vm4, %v506_v6, %v512_v5 }
 0x177   : > { %v531_v28 = vmul.f32 %v934_v32, %v520_v33  ;;  %v532_v55 = vmul.f32 %v935_v40, %v517_v41  ;;  %v936_v40 = vld [vmem:[%s1537_s3 + $0x80] sm:$0xff] }
 0x179   : > { %v550_v7 = vpop.permute.xlu0 %549  ;;  %v544_v8 = vpop.permute.xlu1 %543  ;;  %v537_v6 = vadd.f32 %v531_v28, %v499_v60  ;;  %v538_v17 = vadd.f32 %v532_v55, %v500_v4  ;;  %v959_v55 = vld [vmem:[%s1537_s3 + $0x168] sm:$0xff] }
 0x17a   : > { %v558_v50 = vsel %vm553_vm5, %v550_v7, %v544_v8  ;;  %v555_v53 = vsel %vm553_vm5, %v544_v8, %v550_v7  ;;  %v451_v8 = vld [vmem:[%s1537_s3 + $0x20] sm:$0xff] }
 0x17b   : > { %v569_v61 = vmul.f32 %v940_v49, %v558_v50  ;;  %v570_v5 = vmul.f32 %v941_v52, %v555_v53  ;;  %v942_v52 = vld [vmem:[%s1537_s3 + $0xb0] sm:$0xff] }
 0x17d   : > { %v588_v9 = vpop.permute.xlu0 %587  ;;  %v582_v10 = vpop.permute.xlu1 %581  ;;  %v575_v25 = vadd.f32 %v569_v61, %v537_v6  ;;  %v576_v29 = vadd.f32 %v570_v5, %v538_v17  ;;  %v954_v17 = vld [vmem:[%s1537_s3 + $0x140] sm:$0xff] }
 0x17e   : > { %v593_v56 = vsel %vm591_vm6, %v582_v10, %v588_v9  ;;  %v596_v63 = vsel %vm591_vm6, %v588_v9, %v582_v10  ;;  %v452_v9 = vld [vmem:[%s1537_s3 + $0x28] sm:$0xff] }
 0x17f   : > { %v607_v7 = vmul.f32 %v946_v30, %v593_v56  ;;  %v608_v20 = vmul.f32 %v947_v62, %v596_v63  ;;  %v949_v63 = vld [vmem:[%s1537_s3 + $0x118] sm:$0xff] }
 0x181   : > { %v1307_v11 = vpop.permute.xlu0 %625  ;;  %v1309_v12 = vpop.permute.xlu1 %619  ;;  %v613_v39 = vadd.f32 %v607_v7, %v575_v25 }
 0x182   : > { %v631_v27 = vsel %vm629_vm7, %v1309_v12, %v1307_v11  ;;  %v634_v32 = vsel %vm629_vm7, %v1307_v11, %v1309_v12  ;;  %v614_v11 = vadd.f32 %v608_v20, %v576_v29  ;;  %v955_v20 = vld [vmem:[%s1537_s3 + $0x148] sm:$0xff] }
 0x183   : > { %v645_v12 = vmul.f32 %v952_v26, %v631_v27  ;;  %v646_v51 = vmul.f32 %v953_v31, %v634_v32 }
 0x185   : > { %v1311_v45 = vpop.permute.xlu0 %663  ;;  %v1313_v13 = vpop.permute.xlu1 %657  ;;  %v651_v26 = vadd.f32 %v645_v12, %v613_v39  ;;  %v652_v27 = vadd.f32 %v646_v51, %v614_v11  ;;  %v966_v51 = vld [vmem:[%s1537_s3 + $0x1a0] sm:$0xff] }
 0x186   : > { %v672_v28 = vsel %vm667_vm8, %v1311_v45, %v1313_v13  ;;  %v669_v61 = vsel %vm667_vm8, %v1313_v13, %v1311_v45  ;;  %v958_v45 = vld [vmem:[%s1537_s3 + $0x160] sm:$0xff]  ;;  %v965_v13 = vld [vmem:[%s1537_s3 + $0x198] sm:$0xff] }
 0x189   : > { %v437_v14 = vpop.permute.xlu0 %436  ;;  %v1315_v15 = vpop.permute.xlu1 %701 }
 0x18a   : > { %v710_v62 = vsel %vm705_vm9, %v1315_v15, %v1295_v57 }
 0x18d   : > { %v476_v18 = vpop.permute.xlu0 %475  ;;  %v431_v19 = vpop.permute.xlu1 %430 }
 0x18e   : > { %v443_v10 = vsel %vm440_vm2, %v431_v19, %v437_v14  ;;  %v446_v16 = vsel %vm440_vm2, %v437_v14, %v431_v19  ;;  %v930_v14 = vld [vmem:[%s1537_s3 + $0x50] sm:$0xff] }
 0x18f   : > { %v457_v33 = vmul.f32 %v451_v8, %v446_v16  ;;  %v458_v36 = vmul.f32 %v452_v9, %v443_v10  ;;  %v684_v10 = vmul.f32 %v959_v55, %v672_v28  ;;  %v707_v16 = vsel %vm705_vm9, %v1295_v57, %v1315_v15  ;;  %v967_v28 = vld [vmem:[%s1537_s3 + $0x1a8] sm:$0xff] }
 0x191   : > { %v514_v34 = vpop.permute.xlu0 %513  ;;  %v470_v35 = vpop.permute.xlu1 %469  ;;  %v463_v30 = vadd.f32 %v457_v33, %v424_v21  ;;  %v464_v56 = vadd.f32 %v458_v36, %v425_v22 }
 0x192   : > { %v480_v38 = vsel %vm477_vm3, %v470_v35, %v476_v18  ;;  %v483_v19 = vsel %vm477_vm3, %v476_v18, %v470_v35  ;;  %v937_v18 = vld [vmem:[%s1537_s3 + $0x88] sm:$0xff] }
 0x193   : > { %v495_v46 = vmul.f32 %v930_v14, %v483_v19  ;;  %v496_v47 = vmul.f32 %v931_v37, %v480_v38  ;;  %v683_v14 = vmul.f32 %v958_v45, %v669_v61  ;;  %v722_v37 = vmul.f32 %v965_v13, %v710_v62  ;;  %v960_v38 = vld [vmem:[%s1537_s3 + $0x170] sm:$0xff]  ;;  %v961_v19 = vld [vmem:[%s1537_s3 + $0x178] sm:$0xff]  ;;  %v963_v45 = vld [vmem:[%s1537_s3 + $0x188] sm:$0xff] }
 0x195   : > { %v552_v58 = vpop.permute.xlu0 %551  ;;  %v508_v59 = vpop.permute.xlu1 %507  ;;  %v501_v4 = vadd.f32 %v495_v46, %v463_v30  ;;  %v502_v5 = vadd.f32 %v496_v47, %v464_v56 }
 0x196   : > { %v518_v35 = vsel %vm515_vm4, %v508_v59, %v514_v34  ;;  %v521_v41 = vsel %vm515_vm4, %v514_v34, %v508_v59  ;;  %v943_v34 = vld [vmem:[%s1537_s3 + $0xb8] sm:$0xff] }
 0x197   : > { %v533_v59 = vmul.f32 %v936_v40, %v521_v41  ;;  %v534_v60 = vmul.f32 %v937_v18, %v518_v35  ;;  %v690_v18 = vadd.f32 %v684_v10, %v652_v27 }
 0x199   : > { %v590_v23 = vpop.permute.xlu0 %589  ;;  %v546_v24 = vpop.permute.xlu1 %545  ;;  %v540_v57 = vadd.f32 %v534_v60, %v502_v5 }
 0x19a   : > { %v556_v53 = vsel %vm553_vm5, %v546_v24, %v552_v58  ;;  %v559_v54 = vsel %vm553_vm5, %v552_v58, %v546_v24  ;;  %v948_v58 = vld [vmem:[%s1537_s3 + $0x110] sm:$0xff]  ;;  %v539_v24 = vadd.f32 %v533_v59, %v501_v4 }
 0x19b   : > { %v571_v6 = vmul.f32 %v942_v52, %v559_v54  ;;  %v572_v7 = vmul.f32 %v943_v34, %v556_v53 }
 0x19d   : > { %v628_v49 = vpop.permute.xlu0 %627  ;;  %v584_v50 = vpop.permute.xlu1 %583  ;;  %v577_v29 = vadd.f32 %v571_v6, %v539_v24  ;;  %v578_v31 = vadd.f32 %v572_v7, %v540_v57 }
 0x19e   : > { %v594_v0 = vsel %vm591_vm6, %v584_v50, %v590_v23  ;;  %v597_v3 = vsel %vm591_vm6, %v590_v23, %v584_v50  ;;  %v964_v23 = vld [vmem:[%s1537_s3 + $0x190] sm:$0xff]  ;;  %v728_v50 = vadd.f32 %v722_v37, %v690_v18 }
 0x19f   : > { %v609_v15 = vmul.f32 %v948_v58, %v594_v0  ;;  %v610_v25 = vmul.f32 %v949_v63, %v597_v3  ;;  %v721_v35 = vmul.f32 %v964_v23, %v707_v16  ;;  %v962_v3 = vld [vmem:[%s1537_s3 + $0x180] sm:$0xff] }
 0x1a0   : > { %v752_v58 = vadd.f32 %v1206_v43, %v728_v50 }
 0x1a1   : > { %v666_v8 = vpop.permute.xlu0 %665  ;;  %v622_v9 = vpop.permute.xlu1 %621  ;;  %v615_v11 = vadd.f32 %v609_v15, %v577_v29  ;;  %v616_v12 = vadd.f32 %v610_v25, %v578_v31 }
 0x1a2   : > { %v632_v21 = vsel %vm629_vm7, %v622_v9, %v628_v49  ;;  %v635_v22 = vsel %vm629_vm7, %v628_v49, %v622_v9  ;;  %v689_v49 = vadd.f32 %v683_v14, %v651_v26  ;;  %v767_v14 = vld [vmem:[%s1539_s5] sm:$0xff] }
 0x1a3   : > { %v647_v32 = vmul.f32 %v954_v17, %v632_v21  ;;  %v648_v33 = vmul.f32 %v955_v20, %v635_v22 }
 0x1a4   : > { %v727_v54 = vadd.f32 %v721_v35, %v689_v49 }
 0x1a5   : > { %v704_v36 = vpop.permute.xlu0 %703  ;;  %v660_v40 = vpop.permute.xlu1 %659  ;;  %v653_v52 = vadd.f32 %v647_v32, %v615_v11  ;;  %v654_v34 = vadd.f32 %v648_v33, %v616_v12 }
 0x1a6   : > { %v670_v39 = vsel %vm667_vm8, %v660_v40, %v666_v8  ;;  %v673_v41 = vsel %vm667_vm8, %v666_v8, %v660_v40  ;;  %v751_v5 = vadd.f32 %v1206_v43, %v727_v54  ;;  %v758_v8 = vmax.f32 %v752_v58, 0.0 }
 0x1a7   : > { %v685_v46 = vmul.f32 %v960_v38, %v670_v39  ;;  %v686_v47 = vmul.f32 %v961_v19, %v673_v41 }
 0x1a8   : > { %v757_v20 = vmax.f32 %v751_v5, 0.0 }
 0x1a9   : > { %v698_v53 = vpop.permute.xlu1 %697  ;;  %v691_v56 = vadd.f32 %v685_v46, %v653_v52  ;;  %v692_v59 = vadd.f32 %v686_v47, %v654_v34  ;;  %v700_v60 = vpop.permute.xlu0 %699 }
 0x1aa   : > { %v708_v55 = vsel %vm705_vm9, %v698_v53, %v704_v36  ;;  %v711_v30 = vsel %vm705_vm9, %v704_v36, %v698_v53  ;;  %v706_v13 = vsel %vm705_vm9, %v1282_v48, %v700_v60  ;;  %v709_v4 = vsel %vm705_vm9, %v700_v60, %v1282_v48 }
 0x1ab   : > { %v723_v61 = vmul.f32 %v966_v51, %v708_v55  ;;  %v724_v62 = vmul.f32 %v967_v28, %v711_v30  ;;  %v719_v9 = vmul.f32 %v962_v3, %v706_v13  ;;  %v720_v10 = vmul.f32 %v963_v45, %v709_v4 }
 0x1ac   : > { %v764_v48 = vmin.f32 %v758_v8, 6.0  ;;  %v763_v24 = vmin.f32 %v757_v20, 6.0 }
 0x1ad   : > { %v730_v63 = vadd.f32 %v724_v62, %v692_v59  ;;  %v729_v0 = vadd.f32 %v723_v61, %v691_v56  ;;  %v726_v23 = vadd.f32 %v720_v10, %v1303_v1  ;;  %v725_v44 = vadd.f32 %v719_v9, %v1305_v2 }
 0x1af   : > { %v754_v6 = vadd.f32 %v1204_v42, %v730_v63  ;;  %v753_v7 = vadd.f32 %v1204_v42, %v729_v0 }
 0x1b1   : > { %v760_v16 = vmax.f32 %v754_v6, 0.0  ;;  %v759_v17 = vmax.f32 %v753_v7, 0.0 }
 0x1b3   : > { %v766_v21 = vmin.f32 %v760_v16, 6.0  ;;  %v765_v22 = vmin.f32 %v759_v17, 6.0 }
 0x1b5   : > { %804 = vmatprep.subr.mxu1 %v766_v21 }
 0x1b6   : > { %805 = vmatpush1.msra.mxu1 %v765_v22  ;;  %v737_v43 = vpop.permute.xlu1 %736  ;;  %v772_v1 = vpop.permute.xlu0 %771 }
 0x1b7   : > { %v749_v57 = vadd.f32 %v737_v43, %v725_v44  ;;  %v750_v42 = vadd.f32 %v737_v43, %v726_v23  ;;  %806 = vmatprep.subr.mxu1 %v764_v48 }
 0x1b8   : > { %807 = vmatpush1.msra.mxu1 %v763_v24 }
 0x1b9   : > { %v755_v15 = vmax.f32 %v749_v57, 0.0  ;;  %v756_v25 = vmax.f32 %v750_v42, 0.0 }
 0x1bb   : > { %v761_v26 = vmin.f32 %v755_v15, 6.0  ;;  %v762_v27 = vmin.f32 %v756_v25, 6.0 }
 0x1bd   : > { %808 = vmatprep.subr.mxu1 %v762_v27 }
 0x1be   : > { %809 = vmatpush1.msra.mxu1 %v761_v26 }
 0x1bf   : > { %968 = vmatmul.mubr.msk.f32.vlgmr.msra.gmra.mxu1 %vm774_vm10, %v767_v14 }
 0x27f   : > { %v844_v2 = vpop.f32.mrf.mxu1 }
 0x280   : > { %v845_v37 = vadd.f32 %v844_v2, %v772_v1 }
 0x281   : > { %v846_v38 = vpop.f32.mrf.mxu1 }
 0x282   : > { %849 = vst [vmem:[%s278_s22] sm:$0xff] %v845_v37  ;;  %v847_v19 = vadd.f32 %v846_v38, %v772_v1 }
 0x284   : > { %850 = vst [vmem:[%s278_s22 + $0x8] sm:$0xff] %v847_v19 }
 0x285 PF: > { %s17_s24 = sadd.s32 1, %s1000_s24  }
 0x286   : > { %p14_p4 = scmp.ge.s32.totalorder %s17_s24, 4  }
 0x288   :  { %16 = sbr.rel (!%p14_p4) target bundleno = 1 (0x1), region = 86 }

</bundles_post_ra>
